<compile_context>
chip_gen: v5e
topology: v5e:2x2
jax: 0.10.0
libtpu: 0.0.40
codegen_flags: <defaults>
</compile_context>

<pallas_src>
import jax
import jax.numpy as jnp
from jax.experimental import pallas as pl
from jax.experimental.pallas import tpu as pltpu

_LANE = 128


def _round_up(n, m):
    return (n + m - 1) // m * m


def _cdiv(a, b):
    return (a + b - 1) // b


def _vmem_capacity_bytes():
    try:
        return int(pltpu.get_tpu_info().vmem_capacity_bytes)
    except Exception:
        return 64 << 20  # conservative (v7x-sized) fallback


def prepare_rwf_params(V, s, bias, *, param_dtype=jnp.bfloat16):
    """One-time parameter prep (do NOT call per forward).

    V: (out, in), s: (out,), bias: (out,).
    Folds exp(s) into the weight (diag(exp(s)) @ V is static), pre-transposes
    to (in, out), and zero-pads both dims to multiples of 128 so the kernel
    output last dim is lane-dense.  Returns (vt (in_p, out_p), bias (1, out_p)
    f32, out_features).
    """
    out_f, in_f = V.shape
    in_p = _round_up(in_f, _LANE)
    out_p = _round_up(out_f, _LANE)

    w = jnp.exp(s.astype(jnp.float32))[:, None] * V.astype(jnp.float32)  # (out, in)
    vt = jnp.zeros((in_p, out_p), jnp.float32).at[:in_f, :out_f].set(w.T)
    if param_dtype is not None:
        vt = vt.astype(param_dtype)
    b = jnp.zeros((1, out_p), jnp.float32).at[0, :out_f].set(
        bias.astype(jnp.float32))
    return vt, b, out_f


def _rwf_kernel_single_k(x_ref, vt_ref, b_ref, o_ref):
    # Whole reduction in one step: no accumulator round trip, direct epilogue.
    o_ref[...] = (jnp.dot(x_ref[...], vt_ref[...],
                          preferred_element_type=jnp.float32)
                  + b_ref[...]).astype(o_ref.dtype)


def _rwf_kernel_multi_k(x_ref, vt_ref, b_ref, o_ref, acc_ref):
    k = pl.program_id(2)

    @pl.when(k == 0)
    def _():
        acc_ref[...] = jnp.zeros_like(acc_ref)

    acc_ref[...] += jnp.dot(x_ref[...], vt_ref[...],
                            preferred_element_type=jnp.float32)

    @pl.when(k == pl.num_programs(2) - 1)
    def _():
        o_ref[...] = (acc_ref[...] + b_ref[...]).astype(o_ref.dtype)


def _pick_tiles(B, in_p, out_p, x_bytes, w_bytes, o_bytes, sub_mult, budget):
    # Batch-tile candidates: whole batch as one full-dim block when small,
    # otherwise balanced <=512-row tiles rounded to the packed sublane multiple.
    if B <= 512:
        bt0 = B
    else:
        nbt = _cdiv(B, 512)
        bt0 = _round_up(_cdiv(B, nbt), sub_mult)
    bt_cands = []
    bt = bt0
    while True:
        bt_cands.append(bt)
        if bt <= sub_mult:
            break
        nxt = _round_up(_cdiv(bt, 2), sub_mult)
        if nxt >= bt:
            break
        bt = nxt

    def divisors(total):
        n = total // _LANE
        return [d * _LANE for d in range(n, 0, -1) if n % d == 0]

    ot_cands = divisors(out_p)   # descending; prefer out_tile == out_p
    kt_cands = divisors(in_p)    # descending; prefer full-K (single step)

    def est(bt_, ot_, kt_):
        e = (2 * bt_ * kt_ * x_bytes      # x tiles (double-buffered)
             + 2 * kt_ * ot_ * w_bytes    # Vt tiles
             + 2 * ot_ * 4                # bias row
             + 2 * bt_ * ot_ * o_bytes)   # out tiles
        if kt_ < in_p:
            e += bt_ * ot_ * 4            # f32 accumulator
        return e

    for bt_ in bt_cands:
        for ot_ in ot_cands:
            for kt_ in kt_cands:
                if est(bt_, ot_, kt_) <= budget:
                    return bt_, ot_, kt_
    return bt_cands[-1], ot_cands[-1], kt_cands[-1]


def rwf_forward(x, vt, bias, out_features, *,
                batch_tile=None, out_tile=None, k_tile=None,
                compute_dtype=jnp.bfloat16):
    """x: (B, in_features); vt/bias from prepare_rwf_params.

    Returns (B, out_features) in x.dtype.  MXU operands default to bf16 with a
    f32 accumulator/epilogue; pass compute_dtype=None to keep x's dtype.
    """
    B, in_f = x.shape
    in_p, out_p = vt.shape
    out_dtype = x.dtype

    x_dtype = compute_dtype if compute_dtype is not None else x.dtype
    itemsize = jnp.dtype(x_dtype).itemsize
    sub_mult = 8 if itemsize >= 4 else (16 if itemsize == 2 else 32)

    vmem_cap = _vmem_capacity_bytes()
    budget = int(0.75 * vmem_cap)          # generation-aware scoped-VMEM cap

    bt, ot, kt = _pick_tiles(
        B, in_p, out_p,
        jnp.dtype(x_dtype).itemsize, jnp.dtype(vt.dtype).itemsize,
        jnp.dtype(out_dtype).itemsize, sub_mult, budget)
    if batch_tile is not None:
        bt = batch_tile
    if out_tile is not None:
        ot = out_tile
    if k_tile is not None:
        kt = k_tile

    # 64-MiB (v7x-like, 2 TensorCores) parts only: split the batch when neither
    # the batch nor the out grid axis already has >= 2 parallel steps.
    if (vmem_cap <= (80 << 20) and out_p // ot == 1
            and _cdiv(B, bt) == 1 and bt >= 2 * sub_mult):
        bt = _round_up(_cdiv(bt, 2), sub_mult)

    B_pad = _cdiv(B, bt) * bt

    # Activation: no copy when already aligned; otherwise fuse pad + cast.
    needs_pad = (B_pad != B) or (in_p != in_f)
    if needs_pad:
        x_p = jnp.zeros((B_pad, in_p), x_dtype).at[:B, :in_f].set(
            x.astype(x_dtype))
    elif x.dtype != x_dtype:
        x_p = x.astype(x_dtype)
    else:
        x_p = x
    # NOTE: vt is never cast here — it was prepared once in prepare_rwf_params.

    grid_b = B_pad // bt
    grid_o = out_p // ot
    k_steps = in_p // kt

    if k_steps == 1:
        grid = (grid_b, grid_o)
        kernel = _rwf_kernel_single_k
        in_specs = [
            pl.BlockSpec((bt, in_p), lambda i, j: (i, 0)),   # x
            pl.BlockSpec((in_p, ot), lambda i, j: (0, j)),   # Vt (exp(s) folded)
            pl.BlockSpec((1, ot), lambda i, j: (0, j)),      # bias
        ]
        out_specs = pl.BlockSpec((bt, ot), lambda i, j: (i, j))
        scratch = []
        dims = ("parallel", "parallel")
    else:
        grid = (grid_b, grid_o, k_steps)
        kernel = _rwf_kernel_multi_k
        in_specs = [
            pl.BlockSpec((bt, kt), lambda i, j, k: (i, k)),  # x
            pl.BlockSpec((kt, ot), lambda i, j, k: (k, j)),  # Vt (exp(s) folded)
            pl.BlockSpec((1, ot), lambda i, j, k: (0, j)),   # bias
        ]
        out_specs = pl.BlockSpec((bt, ot), lambda i, j, k: (i, j))
        scratch = [pltpu.VMEM((bt, ot), jnp.float32)]
        dims = ("parallel", "parallel", "arbitrary")

    y_full = pl.pallas_call(
        kernel,
        out_shape=jax.ShapeDtypeStruct((B_pad, out_p), out_dtype),
        grid_spec=pltpu.PrefetchScalarGridSpec(
            num_scalar_prefetch=0,
            grid=grid,
            in_specs=in_specs,
            out_specs=out_specs,
            scratch_shapes=scratch,
        ),
        compiler_params=pltpu.CompilerParams(
            dimension_semantics=dims,
            vmem_limit_bytes=budget),
    )(x_p, vt, bias)

    if B_pad != B or out_p != out_features:
        y_full = y_full[:B, :out_features]
    return y_full


if __name__ == "__main__":
    key = jax.random.PRNGKey(0)
    k_x, k_v, k_s = jax.random.split(key, 3)

    batch, in_features, out_features = 8, 32, 64
    mu, sigma = 0.5, 0.1

    # Deterministic parameter init (mirrors nn.Module.__init__ shapes):
    # xavier_normal_: std = sqrt(2 / (fan_in + fan_out))
    xavier_std = (2.0 / (in_features + out_features)) ** 0.5
    V = jax.random.normal(k_v, (out_features, in_features), jnp.float32) * xavier_std
    s = jax.random.normal(k_s, (out_features,), jnp.float32) * sigma + mu
    bias = jnp.zeros((out_features,), jnp.float32)

    x = jax.random.normal(k_x, (batch, in_features), jnp.float32)

    # One-time param prep: fold exp(s) into V, pre-transpose, pad, bf16.
    vt, b2, out_f = prepare_rwf_params(V, s, bias, param_dtype=jnp.bfloat16)

    # NOTE: at this toy size XLA fusion would beat a standalone kernel; the
    # Pallas path is intended for large batch/feature sizes.
    y = rwf_forward(x, vt, b2, out_f)              # bf16 operands, f32 accumulate
    y = jax.block_until_ready(y)
    assert y.shape == (batch, out_features)

    # Reference with matching bf16 operand rounding (f32 accumulation).
    w = jnp.exp(s)[:, None] * V                    # diag(exp(s)) @ V
    w_bf = w.astype(jnp.bfloat16).astype(jnp.float32)
    x_bf = x.astype(jnp.bfloat16).astype(jnp.float32)
    y_ref = x_bf @ w_bf.T + bias
    assert jnp.allclose(y, y_ref, atol=1e-3, rtol=1e-3), (
        float(jnp.max(jnp.abs(y - y_ref))))

    # And stay close to the exact f32 module output (bf16 rounding tolerance).
    y_exact = x @ w.T + bias
    assert jnp.allclose(y, y_exact, atol=5e-2, rtol=5e-2)

    print("KERNEL_OK")
</pallas_src>

<mosaic_0001>
module attributes {stable_mosaic.version = 11 : i64} {
  func.func @_rwf_kernel_single_k(%arg0: i32, %arg1: i32, %arg2: memref<8x128xbf16, #tpu.memory_space<vmem>>, %arg3: memref<128x128xbf16, #tpu.memory_space<vmem>>, %arg4: memref<1x128xf32, #tpu.memory_space<vmem>>, %arg5: memref<8x128xf32, #tpu.memory_space<vmem>>) attributes {dimension_semantics = [#tpu.dimension_semantics<parallel>, #tpu.dimension_semantics<parallel>], iteration_bounds = array<i64: 1, 1>, scalar_prefetch = 0 : i64, scratch_operands = 0 : i64, tpu.core_type = #tpu.core_type<tc>, window_params = [{transform_indices = @transform_0, window_bounds = array<i64: 8, 128>}, {transform_indices = @transform_1, window_bounds = array<i64: 128, 128>}, {transform_indices = @transform_2, window_bounds = array<i64: 1, 128>}, {transform_indices = @transform_3, window_bounds = array<i64: 8, 128>}]} {
    %c0 = arith.constant 0 : index
    %c0_0 = arith.constant 0 : index
    %0 = vector.load %arg2[%c0, %c0_0] : memref<8x128xbf16, #tpu.memory_space<vmem>>, vector<8x128xbf16>
    %c0_1 = arith.constant 0 : index
    %c0_2 = arith.constant 0 : index
    %1 = vector.load %arg3[%c0_1, %c0_2] : memref<128x128xbf16, #tpu.memory_space<vmem>>, vector<128x128xbf16>
    %cst = arith.constant dense<0.000000e+00> : vector<8x128xf32>
    %2 = tpu.matmul %0, %1, %cst {dimension_numbers = #tpu.dot_dimension_numbers<[1], [0], [0], [1], [0, 0, 1, 1], [], []>} : vector<8x128xbf16>, vector<128x128xbf16>, vector<8x128xf32> -> vector<8x128xf32>
    %c0_3 = arith.constant 0 : index
    %c0_4 = arith.constant 0 : index
    %3 = vector.load %arg4[%c0_3, %c0_4] : memref<1x128xf32, #tpu.memory_space<vmem>>, vector<1x128xf32>
    %4 = vector.broadcast %3 : vector<1x128xf32> to vector<8x128xf32>
    %5 = arith.addf %2, %4 : vector<8x128xf32>
    %c0_5 = arith.constant 0 : index
    %c0_6 = arith.constant 0 : index
    %6 = vector.load %arg5[%c0_5, %c0_6] : memref<8x128xf32, #tpu.memory_space<vmem>>, vector<8x128xf32>
    tpu.vector_store %arg5[%c0_5, %c0_6], %5 {strides = array<i32>} : memref<8x128xf32, #tpu.memory_space<vmem>>, vector<8x128xf32>,
    return
  }
  func.func @transform_0(%arg0: i32, %arg1: i32) -> (i32, i32) {
    %c0_i32 = arith.constant 0 : i32
    %c0_i32_0 = arith.constant 0 : i32
    return %arg0, %c0_i32 : i32, i32
  }
  func.func @transform_1(%arg0: i32, %arg1: i32) -> (i32, i32) {
    %c0_i32 = arith.constant 0 : i32
    %c0_i32_0 = arith.constant 0 : i32
    return %c0_i32, %arg1 : i32, i32
  }
  func.func @transform_2(%arg0: i32, %arg1: i32) -> (i32, i32) {
    %c0_i32 = arith.constant 0 : i32
    %c0_i32_0 = arith.constant 0 : i32
    return %c0_i32, %arg1 : i32, i32
  }
  func.func @transform_3(%arg0: i32, %arg1: i32) -> (i32, i32) {
    %c0_i32 = arith.constant 0 : i32
    return %arg0, %arg1 : i32, i32
  }
}

</mosaic_0001>

<bundles_post_ra>
// kernel: tpu_custom_call.1
= control target key start
LH: loop header
LB: loop body
LE: loop exit
PB: predicated region body
PF: predicated region fallthrough
CT: control target
= control target key end

     0   :  { %8 = vsyncpa [#allocation3], 0  ;;  %s307_s0 = inlined_call_operand.hbm [shape: bf16[8,128], index: 0, kind: input, shape index: {}]   ;;  %s308_s1 = inlined_call_operand.hbm [shape: bf16[128,128], index: 1, kind: input, shape index: {}]   ;;  %s309_s2 = inlined_call_operand.vmem [shape: f32[1,128], index: 2, kind: input, shape index: {}]   ;;  %s310_s3 = inlined_call_operand.hbm [shape: f32[8,128], index: 3, kind: output, shape index: {}]  }
   0x1   :  { %9 = vsyncpa [#allocation6], 0 }
   0x2   :  { %10 = vsyncpa [#allocation4], 0  ;;  %s16_s14 = sshll.u32 %s307_s0, 4  ;;  %s270_s15 = smov [#allocation2]   ;;  %s17_s14 = int_to_ptr.hbm [resolvable:$true] %s16_s14 }
   0x3   :  { %s18_s16 = sshll.u32 %s270_s15, 4  ;;  %s26_s19 = sshll.u32 %s308_s1, 4  ;;  %s19_s16 = int_to_ptr.vmem [resolvable:$true] %s18_s16  ;;  %s27_s19 = int_to_ptr.hbm [resolvable:$true] %s26_s19 }
   0x4   :  { %21 = dma.hbm_to_vmem [thread:$0]  %s17_s14, 64, %s19_s16, [#allocation3]  }
   0x5   :  { %s271_s20 = smov [#allocation5]   ;;  %s272_s22 = smov 64  }
   0x6   :  { %s28_s21 = sshll.u32 %s271_s20, 4  ;;  %s273_s23 = smov 4   ;;  %s29_s21 = int_to_ptr.vmem [resolvable:$true] %s28_s21 }
   0x7   :  { %34 = dma.hbm_to_vmem [thread:$0]  %s27_s19, 1024, %s29_s21, [#allocation6], %s272_s22, %s272_s22, %s273_s23  }
   0x8   :  { %264 = dma.done.wait [#allocation3], 64  }
   0x9   :  { %265 = vsyncadd [#allocation3], 4294967232 }
   0xa   :  { %266 = dma.done.wait [#allocation6], 1024  }
   0xb   :  { %267 = vsyncadd [#allocation6], 4294966272  ;;  %v185_v0 = vld [vmem:[#allocation5 + $0x38] sm:$0xff]  ;;  %v184_v1 = vld [vmem:[#allocation5 + $0x30] sm:$0xff]  ;;  %s274_s24 = smov [#allocation7]   ;;  %s135_s28 = sshll.u32 %s310_s3, 4  ;;  %s136_s28 = int_to_ptr.hbm [resolvable:$true] %s135_s28 }
   0xc   :  { %114 = vmatpush.bf16.msra.mxu0 %v185_v0  ;;  %v183_v2 = vld [vmem:[#allocation5 + $0x28] sm:$0xff]  ;;  %v182_v3 = vld [vmem:[#allocation5 + $0x20] sm:$0xff]  ;;  %v181_v4 = vld [vmem:[#allocation5 + $0x18] sm:$0xff]  ;;  %s133_s25 = sshll.u32 %s274_s24, 4  ;;  %s134_s25 = int_to_ptr.vmem [resolvable:$true] %s133_s25 }
   0xd   :  { %v180_v5 = vld [vmem:[#allocation5 + $0x10] sm:$0xff]  ;;  %v179_v6 = vld [vmem:[#allocation5 + $0x8] sm:$0xff]  ;;  %v178_v7 = vld [vmem:[#allocation5] sm:$0xff] }
   0xe   :  { %v45_v8 = vld [vmem:[#allocation2] sm:$0xf] }
   0xf   :  { %v191_v9 = vld [vmem:[%s309_s2] ss:$0 sm:$0xff] }
  0x10   :  { %115 = vmatpush.bf16.msra.mxu0 %v184_v1 }
  0x14   :  { %116 = vmatpush.bf16.msra.mxu0 %v183_v2 }
  0x18   :  { %117 = vmatpush.bf16.msra.mxu0 %v182_v3 }
  0x1c   :  { %118 = vmatpush.bf16.msra.mxu0 %v181_v4 }
  0x20   :  { %119 = vmatpush.bf16.msra.mxu0 %v180_v5 }
  0x24   :  { %120 = vmatpush.bf16.msra.mxu0 %v179_v6 }
  0x28   :  { %121 = vmatpush.bf16.msra.mxu0 %v178_v7 }
  0x2b   :  { %122 = vmatmul.bf16.vlgmr.msra.gmra.mxu0 %v45_v8 }
  0xa8   :  { %v123_v10 = vpop.f32.mrf.mxu0 }
  0xa9   :  { %v124_v11 = vadd.f32 %v191_v9, %v123_v10 }
  0xab   :  { %127 = vst [vmem:[#allocation7] sm:$0xff] %v124_v11 }
  0xac   :  { %138 = dma.vmem_to_hbm [thread:$0]  %s134_s25, 128, %s136_s28, [#allocation4]  }
  0xb0   :  { %v125_v12 = vpop.f32.mrf.mxu0 }
  0xb1   :  { %268 = dma.done.wait [#allocation4], 128  }
  0xb2   :  { %269 = vsyncadd [#allocation4], 4294967168 }
  0xb3   :  { %143 = vsyncpa [#allocation3], 1 }
  0xb4   :  { %144 = vsyncpa [#allocation6], 1 }
  0xb5   :  { %145 = vsyncpa [#allocation4], 1 }

</bundles_post_ra>
